<compile_context>
chip_gen: v5e
topology: v5e:2x2
jax: 0.10.0
libtpu: 0.0.40
codegen_flags: <defaults>
</compile_context>

<pallas_src>
import jax
import jax.numpy as jnp
from jax.experimental import pallas as pl
from jax.experimental.pallas import tpu as pltpu


def _noise_injection_kernel(w_ref, x_ref, n_ref, o_ref):
    # w_ref: (1,) f32 scalar in SMEM
    # x_ref: (TB, C, T_HW) image block
    # n_ref: (TB, 1, T_HW) noise block (broadcast over channels)
    w = w_ref[0]
    x = x_ref[...].astype(jnp.float32)
    n = n_ref[...].astype(jnp.float32)
    o_ref[...] = (x + w * n).astype(o_ref.dtype)


def noise_injection(image, weight, noise=None, *, key=None):
    """image: (N, C, H, W); weight: scalar/(1,); noise: (N, 1, H, W) or None."""
    N, C, H, W = image.shape
    if noise is None:
        if key is None:
            key = jax.random.PRNGKey(0)
        # Matches image.new_empty(batch, 1, H, W).normal_() in the PyTorch module.
        noise = jax.random.normal(key, (N, 1, H, W), dtype=image.dtype)

    HW = H * W
    x = image.reshape(N, C, HW)
    n = noise.reshape(N, 1, HW)
    itemsize = jnp.dtype(image.dtype).itemsize

    # ---- tile selection -----------------------------------------------------
    # Keep the per-step image block <= ~2 MiB: with in(image)+in(noise)+out all
    # double-buffered that is < ~10 MiB of VMEM, safe for v5e's 16 MiB scoped
    # default and v7x's 32 MiB, while being big enough to hit >85% of HBM BW.
    budget_bytes = 2 * 1024 * 1024

    if HW % 128 == 0:
        t_hw = 128
        while (t_hw * 2 <= HW and HW % (t_hw * 2) == 0
               and C * (t_hw * 2) * itemsize <= budget_bytes):
            t_hw *= 2
    else:
        # Full-extent block satisfies the (8,128) rule; lanes stay contiguous.
        t_hw = HW

    tb = 1
    while (tb * 2 <= N and N % (tb * 2) == 0
           and tb * 2 * C * t_hw * itemsize <= budget_bytes
           and (N // (tb * 2)) * (HW // t_hw) >= 2):   # keep >=2 steps for 2 TCs
        tb *= 2

    grid = (N // tb, HW // t_hw)
    w = jnp.asarray(weight, dtype=jnp.float32).reshape(1)

    out = pl.pallas_call(
        _noise_injection_kernel,
        out_shape=jax.ShapeDtypeStruct((N, C, HW), image.dtype),
        grid=grid,
        in_specs=[
            pl.BlockSpec(memory_space=pltpu.MemorySpace.SMEM),        # weight
            pl.BlockSpec((tb, C, t_hw), lambda i, j: (i, 0, j)),      # image
            pl.BlockSpec((tb, 1, t_hw), lambda i, j: (i, 0, j)),      # noise
        ],
        out_specs=pl.BlockSpec((tb, C, t_hw), lambda i, j: (i, 0, j)),
        compiler_params=pltpu.CompilerParams(
            dimension_semantics=("parallel", "parallel")),
        cost_estimate=pl.CostEstimate(
            flops=2 * N * C * HW,
            transcendentals=0,
            bytes_accessed=(2 * N * C * HW + N * HW) * int(itemsize)),
    )(w, x, n)
    # TODO(synk): optionally add input_output_aliases={1: 0} when the caller can
    # donate `image` for an in-place update (cuts one HBM stream, ~33% traffic).
    return out.reshape(N, C, H, W)


if __name__ == "__main__":
    key = jax.random.PRNGKey(0)
    k_img, k_noise, k_default = jax.random.split(key, 3)

    image = jax.random.normal(k_img, (2, 4, 16, 16), dtype=jnp.float32)
    noise = jax.random.normal(k_noise, (2, 1, 16, 16), dtype=jnp.float32)
    # Module initializes weight to zeros; use a nonzero value so the noise
    # path is actually exercised by the check.
    weight = jnp.full((1,), 0.37, dtype=jnp.float32)

    # explicit-noise path
    y = noise_injection(image, weight, noise)
    jax.block_until_ready(y)
    ref = image + weight.reshape(1, 1, 1, 1) * noise
    assert y.shape == image.shape and y.dtype == image.dtype
    assert jnp.allclose(y, ref, atol=1e-6, rtol=1e-6)

    # zero-weight (default parameter init) must return the image unchanged
    y0 = noise_injection(image, jnp.zeros((1,), jnp.float32), noise)
    jax.block_until_ready(y0)
    assert jnp.allclose(y0, image, atol=1e-6, rtol=1e-6)

    # noise=None path (noise sampled in the wrapper, like the PyTorch default)
    y2 = noise_injection(image, weight, noise=None, key=k_default)
    jax.block_until_ready(y2)
    assert y2.shape == image.shape and y2.dtype == image.dtype

    print("KERNEL_OK")
</pallas_src>

<mosaic_0001>
module attributes {stable_mosaic.version = 11 : i64} {
  func.func @_noise_injection_kernel(%arg0: i32, %arg1: i32, %arg2: memref<1xf32, #tpu.memory_space<smem>>, %arg3: memref<1x4x256xf32, #tpu.memory_space<vmem>>, %arg4: memref<1x1x256xf32, #tpu.memory_space<vmem>>, %arg5: memref<1x4x256xf32, #tpu.memory_space<vmem>>) attributes {dimension_semantics = [#tpu.dimension_semantics<parallel>, #tpu.dimension_semantics<parallel>], iteration_bounds = array<i64: 2, 1>, scalar_prefetch = 0 : i64, scratch_operands = 0 : i64, tpu.core_type = #tpu.core_type<tc>, window_params = [{transform_indices = @transform_0, window_bounds = array<i64: 1>}, {transform_indices = @transform_1, window_bounds = array<i64: 1, 4, 256>}, {transform_indices = @transform_2, window_bounds = array<i64: 1, 1, 256>}, {transform_indices = @transform_3, window_bounds = array<i64: 1, 4, 256>}]} {
    %c0 = arith.constant 0 : index
    %0 = memref.load %arg2[%c0] : memref<1xf32, #tpu.memory_space<smem>>
    %c0_0 = arith.constant 0 : index
    %c0_1 = arith.constant 0 : index
    %c0_2 = arith.constant 0 : index
    %1 = vector.load %arg3[%c0_0, %c0_1, %c0_2] : memref<1x4x256xf32, #tpu.memory_space<vmem>>, vector<1x4x256xf32>
    %c0_3 = arith.constant 0 : index
    %c0_4 = arith.constant 0 : index
    %c0_5 = arith.constant 0 : index
    %2 = vector.load %arg4[%c0_3, %c0_4, %c0_5] : memref<1x1x256xf32, #tpu.memory_space<vmem>>, vector<1x1x256xf32>
    %3 = vector.broadcast %0 : f32 to vector<1x1x256xf32>
    %4 = arith.mulf %3, %2 : vector<1x1x256xf32>
    %5 = vector.broadcast %4 : vector<1x1x256xf32> to vector<1x4x256xf32>
    %6 = arith.addf %1, %5 : vector<1x4x256xf32>
    %c0_6 = arith.constant 0 : index
    %c0_7 = arith.constant 0 : index
    %c0_8 = arith.constant 0 : index
    %7 = vector.load %arg5[%c0_6, %c0_7, %c0_8] : memref<1x4x256xf32, #tpu.memory_space<vmem>>, vector<1x4x256xf32>
    tpu.vector_store %arg5[%c0_6, %c0_7, %c0_8], %6 {strides = array<i32>} : memref<1x4x256xf32, #tpu.memory_space<vmem>>, vector<1x4x256xf32>,
    return
  }
  func.func @transform_0(%arg0: i32, %arg1: i32) -> i32 {
    %c0_i32 = arith.constant 0 : i32
    %c0_i32_0 = arith.constant 0 : i32
    return %c0_i32 : i32
  }
  func.func @transform_1(%arg0: i32, %arg1: i32) -> (i32, i32, i32) {
    %c0_i32 = arith.constant 0 : i32
    %c0_i32_0 = arith.constant 0 : i32
    return %arg0, %c0_i32, %arg1 : i32, i32, i32
  }
  func.func @transform_2(%arg0: i32, %arg1: i32) -> (i32, i32, i32) {
    %c0_i32 = arith.constant 0 : i32
    %c0_i32_0 = arith.constant 0 : i32
    return %arg0, %c0_i32, %arg1 : i32, i32, i32
  }
  func.func @transform_3(%arg0: i32, %arg1: i32) -> (i32, i32, i32) {
    %c0_i32 = arith.constant 0 : i32
    %c0_i32_0 = arith.constant 0 : i32
    return %arg0, %c0_i32, %arg1 : i32, i32, i32
  }
}

</mosaic_0001>

<bundles_post_ra>
// kernel: tpu_custom_call.1
= control target key start
LH: loop header
LB: loop body
LE: loop exit
PB: predicated region body
PF: predicated region fallthrough
CT: control target
= control target key end

     0   :  { %s792_s0 = inlined_call_operand.<no memory space> [shape: f32[1], index: 0, kind: input, shape index: {}]   ;;  %s793_s1 = inlined_call_operand.hbm [shape: f32[2,4,256], index: 1, kind: input, shape index: {}]   ;;  %s794_s2 = inlined_call_operand.hbm [shape: f32[2,1,256], index: 2, kind: input, shape index: {}]   ;;  %s795_s3 = inlined_call_operand.hbm [shape: f32[2,4,256], index: 3, kind: output, shape index: {}]  }
   0x1   :  { %8 = sst [smem:[#allocation2]] %s792_s0 }
   0x2   :  { %9 = vsyncpa [#allocation4], 0 }
   0x3   :  { %11 = vsyncpa [#allocation4 + $0x1], 0 }
   0x4   :  { %12 = vsyncpa [#allocation7], 0 }
   0x5   :  { %14 = vsyncpa [#allocation7 + $0x1], 0 }
   0x6   :  { %15 = vsyncpa [#allocation5], 0 }
   0x7   :  { %17 = vsyncpa [#allocation5 + $0x1], 0  ;;  %s654_s14 = smov 0   ;;  %s656_s15 = smov 0  }
   0x8   :  { %s658_s16 = smov 0   ;;  %s660_s17 = smov 0  }
   0x9   :  { %s662_s18 = smov 0   ;;  %s664_s19 = smov 0  }
   0xa LB: > { %s396_s0 = sadd.s32 4294967295, %s629_s19   ;;  %s397_s20 = sadd.s32 4294967294, %s629_s19   ;;  %s629_s19 = sphi %s664_s19, %s23_s19   ;;  %s625_s18 = sphi %s662_s18, %s805_s18   ;;  %s621_s17 = sphi %s660_s17, %s804_s17   ;;  %s617_s16 = sphi %s658_s16, %s803_s16   ;;  %s613_s15 = sphi %s656_s15, %s802_s15   ;;  %s609_s14 = sphi %s654_s14, %s801_s14  }
   0xb   : > { %s35_s21 = sadd.s32 1, %s625_s18  ;;  %s65_s22 = sadd.s32 1, %s617_s16 }
   0xc   : > { %p37_p0 = scmp.ge.s32.totalorder %s35_s21, 2  ;;  %p72_p1 = scmp.ne.s32.totalorder %s617_s16, %s613_s15 }
   0xd   : > { %p73_p2 = scmp.eq.s32.totalorder %s629_s19, 0  ;;  %p78_p3 = scmp.ne.s32.totalorder %s613_s15, %s609_s14 }
   0xe   : > { %s807_s21 = smov (%p37_p0, %s35_s21), 0  ;;  %p79_p5 = scmp.eq.s32.totalorder %s396_s0, 0 }
   0xf   : > { %p695_p4 = por %p73_p2, %p72_p1  ;;  %s60_s24 = ssub.s32 %s625_s18, %s807_s21 }
  0x10   : > { %p132_p6 = scmp.eq.s32.totalorder %s396_s0, 1  ;;  %p63_p7 = scmp.eq.s32.totalorder %s60_s24, 0 }
  0x11   : > { %p701_p8 = por %p79_p5, %p78_p3  ;;  %p138_p10 = scmp.eq.s32.totalorder %s397_s20, 1 }
  0x12   : > { %p705_p9 = por %p132_p6, %p72_p1  ;;  %p399_p12 = scmp.ge.s32.totalorder %s629_s19, 2 }
  0x13   : > { %s710_s27 = scalar_select %p63_p7, %s617_s16, %s65_s22  }
  0x14   : > { %p712_p11 = por %p138_p10, %p78_p3  ;;  %p433_p13 = scmp.lt.s32.totalorder %s629_s19, 2 }
  0x15   : > { %s161_s29 = sand.u32 1, %s617_s16   ;;  %s414_s4 = sshll.u32 %s625_s18, 3 }
  0x16   : > { %s400_s30 = sshll.u32 %s161_s29, 3  ;;  %s172_s7 = scalar_lea.hbm %s793_s1, %s414_s4 }
  0x17   : > { %s165_s8 = scalar_lea.vmem [#allocation3], %s400_s30  ;;  %s174_s10 = sshll.u32 %s172_s7, 4  ;;  %s175_s10 = int_to_ptr.hbm [resolvable:$true] %s174_s10 }
  0x18   : > { %s176_s9 = sshll.u32 %s165_s8, 4  ;;  %p725_p0 = pnand %p433_p13, %p695_p4  ;;  %s177_s9 = int_to_ptr.vmem [resolvable:$true] %s176_s9 }
  0x19   : > { %p405_p1 = scmp.ge.s32.totalorder %s629_s19, 1  ;;  %p202_p2 = scmp.lt.s32.totalorder %s629_s19, 3 }
  0x1a   : > { %s162_s12 = scalar_lea.sflag [#allocation4], %s161_s29  ;;  %s403_s13 = sshll.u32 %s161_s29, 1 }
  0x1b   : > { %425 = dma.hbm_to_vmem [thread:$0]  (!%p725_p0), %s175_s10, 128, %s177_s9, %s162_s12  }
  0x1c   : > { %p203_p3 = pnand %p405_p1, %p202_p2  ;;  %s404_s0 = sshll.u32 %s625_s18, 1 }
  0x1d   : > { %s193_s24 = scalar_lea.hbm %s794_s2, %s404_s0  ;;  %s187_s30 = scalar_lea.vmem [#allocation6], %s403_s13 }
  0x1e   : > { %s197_s23 = sshll.u32 %s187_s30, 4  ;;  %s195_s4 = sshll.u32 %s193_s24, 4  ;;  %s198_s23 = int_to_ptr.vmem [resolvable:$true] %s197_s23  ;;  %s196_s4 = int_to_ptr.hbm [resolvable:$true] %s195_s4 }
  0x1f   : > { %s184_s5 = scalar_lea.sflag [#allocation7], %s161_s29  ;;  %206 = sbr.rel (%p203_p3) target bundleno = 59 (0x3b), region = 32 }
  0x20   : > { %428 = dma.hbm_to_vmem [thread:$0]  (!%p725_p0), %s196_s4, 32, %s198_s23, %s184_s5  }
  0x21   : > { %s740_s6 = sand.u32 (!%p203_p3), 1, %s613_s15  }
  0x22   : > { %s406_s7 = sshll.u32 (!%p203_p3), %s740_s6, 3  ;;  %s209_s8 = scalar_lea.sflag (!%p203_p3), [#allocation4], %s740_s6 }
  0x23   : > { %s212_s9 = scalar_lea.vmem (!%p203_p3), [#allocation3], %s406_s7 }
  0x24   : > { %596 = dma.done.wait (%p701_p8), %s209_s8, 128  }
  0x25   : > { %598 = vsyncadd (%p701_p8), %s209_s8, 4294967168  ;;  %s407_s29 = sshll.u32 %s740_s6, 1  ;;  %s219_s10 = scalar_lea.sflag [#allocation7], %s740_s6 }
  0x26   : > { %s222_s11 = scalar_lea.vmem [#allocation6], %s407_s29 }
  0x27   : > { %600 = dma.done.wait (%p701_p8), %s219_s10, 32  }
  0x28   : > { %602 = vsyncadd (%p701_p8), %s219_s10, 4294967264  ;;  %s254_s12 = sld [smem:[#allocation2]]  ;;  %s415_s13 = sshll.u32 %s621_s17, 3  ;;  %v256_v0 = vld [vmem:[%s222_s11] sm:$0x3]  ;;  %vm263_vm0 = vcmask 1043456  }
  0x29   : > { %s282_s22 = scalar_lea.hbm %s795_s3, %s415_s13  ;;  %v255_v5 = vld [vmem:[%s212_s9] sm:$0xff]  ;;  %s250_s24 = scalar_lea.vmem [#allocation8], %s406_s7 }
  0x2a   : > { %s284_s25 = sshll.u32 %s250_s24, 4  ;;  %s286_s30 = sshll.u32 %s282_s22, 4  ;;  %s285_s25 = int_to_ptr.vmem [resolvable:$true] %s284_s25  ;;  %s287_s30 = int_to_ptr.hbm [resolvable:$true] %s286_s30 }
  0x2b   : > { %s269_s17 = scalar_lea.sflag [#allocation5], %s740_s6  ;;  %s557_s23 = sshra.s32 %s287_s30, 4  ;;  %s558_s23 = int_to_ptr.hbm [resolvable:$true] %s557_s23 }
  0x2c   : > { %s559_s4 = scalar_lea.hbm %s558_s23, 8  ;;  %s563_s9 = scalar_lea.hbm %s795_s3, 16 }
  0x2d   : > { %p560_p4 = scmp.ne.s32.totalorder %s558_s23, %s559_s4  ;;  %p564_p7 = scmp.lt.s32.totalorder %s558_s23, %s795_s3 }
  0x2e   : > { %v257_v1 = vstv %s254_s12  ;;  %p565_p8 = scmp.lt.s32.totalorder %s563_s9, %s559_s4 }
  0x2f   : > { %v258_v2 = vmul.f32 %v257_v1, %v256_v0  ;;  %p561_p5 = pnand %p560_p4, %p705_p9 }
  0x30   : > { %p566_p10 = por %p565_p8, %p564_p7 }
  0x31   : > { %v260_v3 = vperm.slane %v258_v2, 0  ;;  %v261_v4 = vperm.slane %v258_v2, 1  ;;  %p562_p6 = pneg %p561_p5 }
  0x33   : > { %v262_v6 = vrot.slane %v261_v4, 4  ;;  %p567_p13 = pnand %p566_p10, %p562_p6 }
  0x35   : > { %v264_v7 = vsel %vm263_vm0, %v260_v3, %v262_v6 }
  0x36   : > { %v266_v8 = vadd.f32 %v264_v7, %v255_v5 }
  0x38   : > { %267 = vst [vmem:[%s250_s24] sm:$0xff] %v266_v8 }
  0x39   : > { %570 = shalt.err (!%p567_p13)
}
  0x3a   : > { %420 = dma.vmem_to_hbm [thread:$0]  (%p705_p9), %s285_s25, 128, %s287_s30, %s269_s17  }
  0x3b PF: > { %s298_s6 = sand.u32 1, %s609_s14   ;;  %p430_p0 = pnand %p399_p12, %p712_p11 }
  0x3c   : > { %s299_s10 = scalar_lea.sflag [#allocation5], %s298_s6 }
  0x3d   : > { %p431_p1 = pneg %p430_p0 }
  0x3f   : > { %604 = dma.done.wait (%p431_p1), %s299_s10, 128  }
  0x40   : > { %606 = vsyncadd (%p431_p1), %s299_s10, 4294967168  ;;  %s23_s19 = sadd.s32 1, %s629_s19   ;;  %s801_s14 = smov %s613_s15 }
  0x41   : > { %p20_p2 = scmp.ge.s32.totalorder %s23_s19, 4   ;;  %s802_s15 = smov %s617_s16 }
  0x42   : > { %s803_s16 = smov %s710_s27  ;;  %s804_s17 = smov %s625_s18 }
  0x43   : > { %s805_s18 = smov %s807_s21  ;;  %22 = sbr.rel (!%p20_p2) target bundleno = 10 (0xa), region = 90 }
  0x48   :  { %305 = vsyncpa [#allocation4], 1 }
  0x49   :  { %307 = vsyncpa [#allocation4 + $0x1], 1 }
  0x4a   :  { %308 = vsyncpa [#allocation7], 1 }
  0x4b   :  { %310 = vsyncpa [#allocation7 + $0x1], 1 }
  0x4c   :  { %311 = vsyncpa [#allocation5], 1 }
  0x4d   :  { %313 = vsyncpa [#allocation5 + $0x1], 1 }

</bundles_post_ra>
